<compile_context>
chip_gen: v7x
topology: tpu7x:2x2x1
jax: 0.10.0
libtpu: 0.0.40
codegen_flags: <defaults>
</compile_context>

<pallas_src>
import jax
import jax.numpy as jnp
from jax import lax
from jax.experimental import pallas as pl
from jax.experimental.pallas import tpu as pltpu

B = 2
VOCAB = 50
SEQ = 10                             # Conv1d #1 in_channels (seq positions)
EMB = 10                             # Conv1d "length" axis (embedding dim)
C1 = 64
C2 = 64
K = 3
L1 = EMB - K + 1                     # 8
L2 = L1 - K + 1                      # 6
LP = (L2 + 2 * 1 - 2) // 3 + 1       # 3  (MaxPool1d(2, stride=3, padding=1))
H1 = 100
H2 = 10
FLAT = C2 * LP                       # 192

# Row layout of the packed conv buffer (all rows are 64 lanes wide).
W1_OFF = 0                            # rows [0,30): conv1 taps, row = k*SEQ + c_in
B1_ROW = K * SEQ                      # 30: conv1 bias
B2_ROW = B1_ROW + 1                   # 31: conv2 bias
W2_OFF = B2_ROW + 1                   # 32: conv2 taps, row = 32 + k*C1 + c_in (8-aligned)
EMB_OFF = W2_OFF + K * C1             # 224: embedding table^T, lane-padded 50 -> 64
CONV_ROWS = EMB_OFF + EMB             # 234

# Activation row counts (batch blocks live at row stride EMB = 10).
XR = B * EMB                          # 20 rows of x_rows
R1 = XR - (K - 1)                     # 18 rows of h1 (valid rows: b*10 + l, l < 8)
R2 = R1 - (K - 1)                     # 16 rows of h2 (valid rows: b*10 + l, l < 6)


def _net_kernel(idx_ref, conv_ref, fc1_ref, fc2_ref, out_ref):
    f32 = jnp.float32

    # ---- Embedding gather fused as a one-hot matmul -------------------------
    # x_cols[l, b*SEQ + c] = emb_tbl[idx[b, c], l]
    idx_row = idx_ref[...]                                         # (1, B*SEQ) int32
    iota_v = lax.broadcasted_iota(jnp.int32, (C1, B * SEQ), 0)     # vocab ids (padded to 64)
    onehot_t = (iota_v == idx_row).astype(f32)                     # (64, B*SEQ)
    emb_t = conv_ref[EMB_OFF:EMB_OFF + EMB, :]                     # (EMB, 64), cols >=50 are 0
    x_cols = jnp.dot(emb_t, onehot_t, preferred_element_type=f32)  # (EMB, B*SEQ)

    # Move to batch-major rows once, on the smallest tensor:
    # x_rows[b*EMB + l, c] = x[b, c, l]   (row = length position, col = in-channel)
    x_rows = jnp.concatenate(
        [x_cols[:, b * SEQ:(b + 1) * SEQ] for b in range(B)], axis=0)   # (20, 10)

    # ---- Conv1d(10, 64, 3): per-tap accumulation (no im2col repack) ---------
    # h1[b*10 + l, o] = relu(b1[o] + sum_{k,c} x[b, c, l+k] * w1[o, c, k])
    acc1 = jnp.dot(x_rows[0:R1, :], conv_ref[W1_OFF:W1_OFF + SEQ, :],
                   preferred_element_type=f32)
    for k in range(1, K):
        w1k = conv_ref[W1_OFF + k * SEQ: W1_OFF + (k + 1) * SEQ, :]      # (10, 64)
        acc1 = acc1 + jnp.dot(x_rows[k:k + R1, :], w1k,
                              preferred_element_type=f32)
    h1 = jnp.maximum(acc1 + conv_ref[B1_ROW:B1_ROW + 1, :], 0.0)         # (18, 64)

    # ---- Conv1d(64, 64, 3): per-tap accumulation -----------------------------
    acc2 = jnp.dot(h1[0:R2, :], conv_ref[W2_OFF:W2_OFF + C1, :],
                   preferred_element_type=f32)
    for k in range(1, K):
        w2k = conv_ref[W2_OFF + k * C1: W2_OFF + (k + 1) * C1, :]        # (64, 64)
        acc2 = acc2 + jnp.dot(h1[k:k + R2, :], w2k,
                              preferred_element_type=f32)
    h2 = jnp.maximum(acc2 + conv_ref[B2_ROW:B2_ROW + 1, :], 0.0)         # (16, 64)
    # Rows b*10 + {6..9} of h1/h2 are cross-batch garbage (finite); the pooled
    # row selection below only ever reads rows b*10 + {0, 2, 3, 5}.

    # ---- MaxPool1d(2, stride=3, padding=1): windows [pad,x0], [x2,x3], [x5,pad]
    # Row gathers as tiny 0/1 selector matmuls on the (idle) MXU.
    r_iota = lax.broadcasted_iota(jnp.int32, (B, R2), 1)
    base = lax.broadcasted_iota(jnp.int32, (B, R2), 0) * EMB

    def gather_rows(off):
        sel = (r_iota == base + off).astype(f32)                         # (B, 16)
        return jnp.dot(sel, h2, preferred_element_type=f32)              # (B, 64)

    p0 = gather_rows(0)
    p1 = jnp.maximum(gather_rows(2), gather_rows(3))
    p2 = gather_rows(5)

    # ---- Linear(192,100) as LP=3 lane-aligned matmuls (torch flatten c*LP+p) -
    y1 = (jnp.dot(p0, fc1_ref[0:C2, :], preferred_element_type=f32)
          + jnp.dot(p1, fc1_ref[C2:2 * C2, :], preferred_element_type=f32)
          + jnp.dot(p2, fc1_ref[2 * C2:3 * C2, :], preferred_element_type=f32)
          + fc1_ref[LP * C2:LP * C2 + 1, :])
    y1 = jnp.maximum(y1, 0.0)                                            # (B, 100)

    # ---- Linear(100,10) + Softmax(dim=1) -------------------------------------
    y2 = (jnp.dot(y1, fc2_ref[0:H1, :], preferred_element_type=f32)
          + fc2_ref[H1:H1 + 1, :])
    y2 = y2 - jnp.max(y2, axis=1, keepdims=True)
    e = jnp.exp(y2)
    # Exact division keeps 1e-5 parity with the f32 reference.
    out_ref[...] = e / jnp.sum(e, axis=1, keepdims=True)                 # (B, 10)


def prepare_params(params):
    """One-time parameter prep (hoisted out of the forward pass).

    Packs the 9 parameter tensors (+ lane-padded embedding table) into three
    flat f32 buffers grouped by lane width, so the gridless kernel issues 4
    input DMAs instead of 10, and every in-kernel contraction is plain A @ B.
    """
    emb_tbl, w1, b1, w2, b2, wl1, bl1, wl2, bl2 = params
    # Conv taps in plain-A@B form: tap k is (c_in, c_out) with W_k[c, o] = w[o, c, k].
    w1_taps = jnp.transpose(w1, (2, 1, 0)).reshape(K * SEQ, C1)          # (30, 64)
    w2_taps = jnp.transpose(w2, (2, 1, 0)).reshape(K * C1, C2)           # (192, 64)
    emb_pad = jnp.pad(emb_tbl.T, ((0, 0), (0, C1 - VOCAB)))              # (10, 64)
    conv_pack = jnp.concatenate(
        [w1_taps,                 # rows [0, 30)
         b1.reshape(1, C1),       # row 30
         b2.reshape(1, C2),       # row 31
         w2_taps,                 # rows [32, 224), taps 8-row aligned
         emb_pad],                # rows [224, 234)
        axis=0).astype(jnp.float32)                                      # (234, 64)
    assert conv_pack.shape == (CONV_ROWS, C1)
    # Linear(192,100): torch flatten order is c*LP + p  ->  rows p*C2 + c.
    wl1_taps = jnp.transpose(wl1.reshape(H1, C2, LP), (2, 1, 0)).reshape(LP * C2, H1)
    fc1_pack = jnp.concatenate([wl1_taps, bl1.reshape(1, H1)],
                               axis=0).astype(jnp.float32)               # (193, 100)
    fc2_pack = jnp.concatenate([wl2.T, bl2.reshape(1, H2)],
                               axis=0).astype(jnp.float32)               # (101, 10)
    return conv_pack, fc1_pack, fc2_pack


@jax.jit
def net_forward(x_idx, prepped):
    conv_pack, fc1_pack, fc2_pack = prepped
    vmem = pl.BlockSpec(memory_space=pltpu.MemorySpace.VMEM)
    idx_row = x_idx.reshape(1, B * SEQ).astype(jnp.int32)
    return pl.pallas_call(
        _net_kernel,
        out_shape=jax.ShapeDtypeStruct((B, H2), jnp.float32),
        in_specs=[vmem] * 4,
        out_specs=vmem,
    )(idx_row, conv_pack, fc1_pack, fc2_pack)


def net_reference(x_idx, params):
    """Plain-JAX reference with PyTorch NCL semantics (for verification)."""
    emb_tbl, w1, b1, w2, b2, wl1, bl1, wl2, bl2 = params
    x = emb_tbl[x_idx]                                   # (B, 10, 10) == NCL
    h1 = jax.lax.conv_general_dilated(
        x, w1, window_strides=(1,), padding='VALID',
        dimension_numbers=('NCH', 'OIH', 'NCH')) + b1[None, :, None]
    h1 = jnp.maximum(h1, 0.0)                            # (B, 64, 8)
    h2 = jax.lax.conv_general_dilated(
        h1, w2, window_strides=(1,), padding='VALID',
        dimension_numbers=('NCH', 'OIH', 'NCH')) + b2[None, :, None]
    h2 = jnp.maximum(h2, 0.0)                            # (B, 64, 6)
    pad = jnp.pad(h2, ((0, 0), (0, 0), (1, 1)), constant_values=-jnp.inf)
    pooled = jnp.stack([pad[..., 0:2].max(-1), pad[..., 3:5].max(-1),
                        pad[..., 6:8].max(-1)], axis=-1)  # (B, 64, 3)
    flat = pooled.reshape(B, FLAT)
    y1 = jnp.maximum(flat @ wl1.T + bl1, 0.0)
    y2 = y1 @ wl2.T + bl2
    return jax.nn.softmax(y2, axis=1)


def init_params(key):
    ks = jax.random.split(key, 9)
    emb_tbl = jax.random.normal(ks[0], (VOCAB, EMB), jnp.float32)
    w1 = jax.random.normal(ks[1], (C1, SEQ, K), jnp.float32) * 0.1
    b1 = jax.random.normal(ks[2], (C1,), jnp.float32) * 0.1
    w2 = jax.random.normal(ks[3], (C2, C1, K), jnp.float32) * 0.1
    b2 = jax.random.normal(ks[4], (C2,), jnp.float32) * 0.1
    wl1 = jax.random.normal(ks[5], (H1, FLAT), jnp.float32) * 0.05
    bl1 = jax.random.normal(ks[6], (H1,), jnp.float32) * 0.05
    wl2 = jax.random.normal(ks[7], (H2, H1), jnp.float32) * 0.05
    bl2 = jax.random.normal(ks[8], (H2,), jnp.float32) * 0.05
    return (emb_tbl, w1, b1, w2, b2, wl1, bl1, wl2, bl2)


if __name__ == "__main__":
    key = jax.random.PRNGKey(0)
    k_param, k_x = jax.random.split(key)
    params = init_params(k_param)
    prepped = prepare_params(params)          # one-time weight packing (hoisted)
    x_idx = jax.random.randint(k_x, (B, SEQ), 0, VOCAB, dtype=jnp.int32)

    out = jax.block_until_ready(net_forward(x_idx, prepped))
    ref = jax.block_until_ready(net_reference(x_idx, params))

    assert out.shape == (B, H2), out.shape
    assert jnp.allclose(out, ref, rtol=1e-5, atol=1e-5), (out, ref)
    assert jnp.allclose(jnp.sum(out, axis=1), 1.0, atol=1e-5)
    print("KERNEL_OK")
</pallas_src>

<mosaic_0001>
module attributes {stable_mosaic.version = 11 : i64} {
  func.func @_net_kernel(%arg0: memref<1x20xi32, #tpu.memory_space<vmem>>, %arg1: memref<234x64xf32, #tpu.memory_space<vmem>>, %arg2: memref<193x100xf32, #tpu.memory_space<vmem>>, %arg3: memref<101x10xf32, #tpu.memory_space<vmem>>, %arg4: memref<2x10xf32, #tpu.memory_space<vmem>>) attributes {dimension_semantics = [], scalar_prefetch = 0 : i64, scratch_operands = 0 : i64, tpu.core_type = #tpu.core_type<tc>} {
    %c0 = arith.constant 0 : index
    %c0_0 = arith.constant 0 : index
    %0 = vector.load %arg0[%c0, %c0_0] : memref<1x20xi32, #tpu.memory_space<vmem>>, vector<1x20xi32>
    %1 = tpu.iota {dimensions = array<i32: 0>} : vector<64x20xi32>
    %2 = vector.broadcast %0 : vector<1x20xi32> to vector<64x20xi32>
    %3 = arith.cmpi eq, %1, %2 : vector<64x20xi32>
    %4 = arith.extui %3 : vector<64x20xi1> to vector<64x20xi32>
    %5 = arith.sitofp %4 : vector<64x20xi32> to vector<64x20xf32>
    %c224 = arith.constant 224 : index
    %c0_1 = arith.constant 0 : index
    %6 = vector.load %arg1[%c224, %c0_1] : memref<234x64xf32, #tpu.memory_space<vmem>>, vector<10x64xf32>
    %cst = arith.constant dense<0.000000e+00> : vector<10x20xf32>
    %7 = tpu.matmul %6, %5, %cst {dimension_numbers = #tpu.dot_dimension_numbers<[1], [0], [0], [1], [0, 0, 1, 1], [], []>} : vector<10x64xf32>, vector<64x20xf32>, vector<10x20xf32> -> vector<10x20xf32>
    %8 = vector.extract_strided_slice %7 {offsets = [0, 0], sizes = [10, 10], strides = [1, 1]} : vector<10x20xf32> to vector<10x10xf32>
    %9 = vector.extract_strided_slice %7 {offsets = [0, 10], sizes = [10, 10], strides = [1, 1]} : vector<10x20xf32> to vector<10x10xf32>
    %10 = tpu.concatenate %8, %9 in 0 : vector<10x10xf32>, vector<10x10xf32> -> vector<20x10xf32>
    %11 = vector.extract_strided_slice %10 {offsets = [0, 0], sizes = [18, 10], strides = [1, 1]} : vector<20x10xf32> to vector<18x10xf32>
    %c0_2 = arith.constant 0 : index
    %c0_3 = arith.constant 0 : index
    %12 = vector.load %arg1[%c0_2, %c0_3] : memref<234x64xf32, #tpu.memory_space<vmem>>, vector<10x64xf32>
    %cst_4 = arith.constant dense<0.000000e+00> : vector<18x64xf32>
    %13 = tpu.matmul %11, %12, %cst_4 {dimension_numbers = #tpu.dot_dimension_numbers<[1], [0], [0], [1], [0, 0, 1, 1], [], []>} : vector<18x10xf32>, vector<10x64xf32>, vector<18x64xf32> -> vector<18x64xf32>
    %c10 = arith.constant 10 : index
    %c0_5 = arith.constant 0 : index
    %14 = vector.load %arg1[%c10, %c0_5] : memref<234x64xf32, #tpu.memory_space<vmem>>, vector<10x64xf32>
    %15 = vector.extract_strided_slice %10 {offsets = [1, 0], sizes = [18, 10], strides = [1, 1]} : vector<20x10xf32> to vector<18x10xf32>
    %cst_6 = arith.constant dense<0.000000e+00> : vector<18x64xf32>
    %16 = tpu.matmul %15, %14, %cst_6 {dimension_numbers = #tpu.dot_dimension_numbers<[1], [0], [0], [1], [0, 0, 1, 1], [], []>} : vector<18x10xf32>, vector<10x64xf32>, vector<18x64xf32> -> vector<18x64xf32>
    %17 = arith.addf %13, %16 : vector<18x64xf32>
    %c20 = arith.constant 20 : index
    %c0_7 = arith.constant 0 : index
    %18 = vector.load %arg1[%c20, %c0_7] : memref<234x64xf32, #tpu.memory_space<vmem>>, vector<10x64xf32>
    %19 = vector.extract_strided_slice %10 {offsets = [2, 0], sizes = [18, 10], strides = [1, 1]} : vector<20x10xf32> to vector<18x10xf32>
    %cst_8 = arith.constant dense<0.000000e+00> : vector<18x64xf32>
    %20 = tpu.matmul %19, %18, %cst_8 {dimension_numbers = #tpu.dot_dimension_numbers<[1], [0], [0], [1], [0, 0, 1, 1], [], []>} : vector<18x10xf32>, vector<10x64xf32>, vector<18x64xf32> -> vector<18x64xf32>
    %21 = arith.addf %17, %20 : vector<18x64xf32>
    %c30 = arith.constant 30 : index
    %c0_9 = arith.constant 0 : index
    %22 = vector.load %arg1[%c30, %c0_9] : memref<234x64xf32, #tpu.memory_space<vmem>>, vector<1x64xf32>
    %23 = vector.broadcast %22 : vector<1x64xf32> to vector<18x64xf32>
    %24 = arith.addf %21, %23 : vector<18x64xf32>
    %cst_10 = arith.constant 0.000000e+00 : f32
    %25 = vector.broadcast %cst_10 : f32 to vector<18x64xf32>
    %26 = arith.maximumf %24, %25 : vector<18x64xf32>
    %27 = vector.extract_strided_slice %26 {offsets = [0, 0], sizes = [16, 64], strides = [1, 1]} : vector<18x64xf32> to vector<16x64xf32>
    %c32 = arith.constant 32 : index
    %c0_11 = arith.constant 0 : index
    %28 = vector.load %arg1[%c32, %c0_11] : memref<234x64xf32, #tpu.memory_space<vmem>>, vector<64x64xf32>
    %cst_12 = arith.constant dense<0.000000e+00> : vector<16x64xf32>
    %29 = tpu.matmul %27, %28, %cst_12 {dimension_numbers = #tpu.dot_dimension_numbers<[1], [0], [0], [1], [0, 0, 1, 1], [], []>} : vector<16x64xf32>, vector<64x64xf32>, vector<16x64xf32> -> vector<16x64xf32>
    %c96 = arith.constant 96 : index
    %c0_13 = arith.constant 0 : index
    %30 = vector.load %arg1[%c96, %c0_13] : memref<234x64xf32, #tpu.memory_space<vmem>>, vector<64x64xf32>
    %31 = vector.extract_strided_slice %26 {offsets = [1, 0], sizes = [16, 64], strides = [1, 1]} : vector<18x64xf32> to vector<16x64xf32>
    %cst_14 = arith.constant dense<0.000000e+00> : vector<16x64xf32>
    %32 = tpu.matmul %31, %30, %cst_14 {dimension_numbers = #tpu.dot_dimension_numbers<[1], [0], [0], [1], [0, 0, 1, 1], [], []>} : vector<16x64xf32>, vector<64x64xf32>, vector<16x64xf32> -> vector<16x64xf32>
    %33 = arith.addf %29, %32 : vector<16x64xf32>
    %c160 = arith.constant 160 : index
    %c0_15 = arith.constant 0 : index
    %34 = vector.load %arg1[%c160, %c0_15] : memref<234x64xf32, #tpu.memory_space<vmem>>, vector<64x64xf32>
    %35 = vector.extract_strided_slice %26 {offsets = [2, 0], sizes = [16, 64], strides = [1, 1]} : vector<18x64xf32> to vector<16x64xf32>
    %cst_16 = arith.constant dense<0.000000e+00> : vector<16x64xf32>
    %36 = tpu.matmul %35, %34, %cst_16 {dimension_numbers = #tpu.dot_dimension_numbers<[1], [0], [0], [1], [0, 0, 1, 1], [], []>} : vector<16x64xf32>, vector<64x64xf32>, vector<16x64xf32> -> vector<16x64xf32>
    %37 = arith.addf %33, %36 : vector<16x64xf32>
    %c31 = arith.constant 31 : index
    %c0_17 = arith.constant 0 : index
    %38 = vector.load %arg1[%c31, %c0_17] : memref<234x64xf32, #tpu.memory_space<vmem>>, vector<1x64xf32>
    %39 = vector.broadcast %38 : vector<1x64xf32> to vector<16x64xf32>
    %40 = arith.addf %37, %39 : vector<16x64xf32>
    %cst_18 = arith.constant 0.000000e+00 : f32
    %41 = vector.broadcast %cst_18 : f32 to vector<16x64xf32>
    %42 = arith.maximumf %40, %41 : vector<16x64xf32>
    %43 = tpu.iota {dimensions = array<i32: 1>} : vector<2x16xi32>
    %44 = tpu.iota {dimensions = array<i32: 0>} : vector<2x16xi32>
    %c10_i32 = arith.constant 10 : i32
    %45 = vector.broadcast %c10_i32 : i32 to vector<2x16xi32>
    %46 = arith.muli %44, %45 : vector<2x16xi32>
    %c0_i32 = arith.constant 0 : i32
    %47 = vector.broadcast %c0_i32 : i32 to vector<2x16xi32>
    %48 = arith.addi %46, %47 : vector<2x16xi32>
    %49 = arith.cmpi eq, %43, %48 : vector<2x16xi32>
    %50 = arith.extui %49 : vector<2x16xi1> to vector<2x16xi32>
    %51 = arith.sitofp %50 : vector<2x16xi32> to vector<2x16xf32>
    %cst_19 = arith.constant dense<0.000000e+00> : vector<2x64xf32>
    %52 = tpu.matmul %51, %42, %cst_19 {dimension_numbers = #tpu.dot_dimension_numbers<[1], [0], [0], [1], [0, 0, 1, 1], [], []>} : vector<2x16xf32>, vector<16x64xf32>, vector<2x64xf32> -> vector<2x64xf32>
    %c2_i32 = arith.constant 2 : i32
    %53 = vector.broadcast %c2_i32 : i32 to vector<2x16xi32>
    %54 = arith.addi %46, %53 : vector<2x16xi32>
    %55 = arith.cmpi eq, %43, %54 : vector<2x16xi32>
    %56 = arith.extui %55 : vector<2x16xi1> to vector<2x16xi32>
    %57 = arith.sitofp %56 : vector<2x16xi32> to vector<2x16xf32>
    %cst_20 = arith.constant dense<0.000000e+00> : vector<2x64xf32>
    %58 = tpu.matmul %57, %42, %cst_20 {dimension_numbers = #tpu.dot_dimension_numbers<[1], [0], [0], [1], [0, 0, 1, 1], [], []>} : vector<2x16xf32>, vector<16x64xf32>, vector<2x64xf32> -> vector<2x64xf32>
    %c3_i32 = arith.constant 3 : i32
    %59 = vector.broadcast %c3_i32 : i32 to vector<2x16xi32>
    %60 = arith.addi %46, %59 : vector<2x16xi32>
    %61 = arith.cmpi eq, %43, %60 : vector<2x16xi32>
    %62 = arith.extui %61 : vector<2x16xi1> to vector<2x16xi32>
    %63 = arith.sitofp %62 : vector<2x16xi32> to vector<2x16xf32>
    %cst_21 = arith.constant dense<0.000000e+00> : vector<2x64xf32>
    %64 = tpu.matmul %63, %42, %cst_21 {dimension_numbers = #tpu.dot_dimension_numbers<[1], [0], [0], [1], [0, 0, 1, 1], [], []>} : vector<2x16xf32>, vector<16x64xf32>, vector<2x64xf32> -> vector<2x64xf32>
    %65 = arith.maximumf %58, %64 : vector<2x64xf32>
    %c5_i32 = arith.constant 5 : i32
    %66 = vector.broadcast %c5_i32 : i32 to vector<2x16xi32>
    %67 = arith.addi %46, %66 : vector<2x16xi32>
    %68 = arith.cmpi eq, %43, %67 : vector<2x16xi32>
    %69 = arith.extui %68 : vector<2x16xi1> to vector<2x16xi32>
    %70 = arith.sitofp %69 : vector<2x16xi32> to vector<2x16xf32>
    %cst_22 = arith.constant dense<0.000000e+00> : vector<2x64xf32>
    %71 = tpu.matmul %70, %42, %cst_22 {dimension_numbers = #tpu.dot_dimension_numbers<[1], [0], [0], [1], [0, 0, 1, 1], [], []>} : vector<2x16xf32>, vector<16x64xf32>, vector<2x64xf32> -> vector<2x64xf32>
    %c0_23 = arith.constant 0 : index
    %c0_24 = arith.constant 0 : index
    %72 = vector.load %arg2[%c0_23, %c0_24] : memref<193x100xf32, #tpu.memory_space<vmem>>, vector<64x100xf32>
    %cst_25 = arith.constant dense<0.000000e+00> : vector<2x100xf32>
    %73 = tpu.matmul %52, %72, %cst_25 {dimension_numbers = #tpu.dot_dimension_numbers<[1], [0], [0], [1], [0, 0, 1, 1], [], []>} : vector<2x64xf32>, vector<64x100xf32>, vector<2x100xf32> -> vector<2x100xf32>
    %c64 = arith.constant 64 : index
    %c0_26 = arith.constant 0 : index
    %74 = vector.load %arg2[%c64, %c0_26] : memref<193x100xf32, #tpu.memory_space<vmem>>, vector<64x100xf32>
    %cst_27 = arith.constant dense<0.000000e+00> : vector<2x100xf32>
    %75 = tpu.matmul %65, %74, %cst_27 {dimension_numbers = #tpu.dot_dimension_numbers<[1], [0], [0], [1], [0, 0, 1, 1], [], []>} : vector<2x64xf32>, vector<64x100xf32>, vector<2x100xf32> -> vector<2x100xf32>
    %76 = arith.addf %73, %75 : vector<2x100xf32>
    %c128 = arith.constant 128 : index
    %c0_28 = arith.constant 0 : index
    %77 = vector.load %arg2[%c128, %c0_28] : memref<193x100xf32, #tpu.memory_space<vmem>>, vector<64x100xf32>
    %cst_29 = arith.constant dense<0.000000e+00> : vector<2x100xf32>
    %78 = tpu.matmul %71, %77, %cst_29 {dimension_numbers = #tpu.dot_dimension_numbers<[1], [0], [0], [1], [0, 0, 1, 1], [], []>} : vector<2x64xf32>, vector<64x100xf32>, vector<2x100xf32> -> vector<2x100xf32>
    %79 = arith.addf %76, %78 : vector<2x100xf32>
    %c192 = arith.constant 192 : index
    %c0_30 = arith.constant 0 : index
    %80 = vector.load %arg2[%c192, %c0_30] : memref<193x100xf32, #tpu.memory_space<vmem>>, vector<1x100xf32>
    %81 = vector.broadcast %80 : vector<1x100xf32> to vector<2x100xf32>
    %82 = arith.addf %79, %81 : vector<2x100xf32>
    %cst_31 = arith.constant 0.000000e+00 : f32
    %83 = vector.broadcast %cst_31 : f32 to vector<2x100xf32>
    %84 = arith.maximumf %82, %83 : vector<2x100xf32>
    %c0_32 = arith.constant 0 : index
    %c0_33 = arith.constant 0 : index
    %85 = vector.load %arg3[%c0_32, %c0_33] : memref<101x10xf32, #tpu.memory_space<vmem>>, vector<100x10xf32>
    %cst_34 = arith.constant dense<0.000000e+00> : vector<2x10xf32>
    %86 = tpu.matmul %84, %85, %cst_34 {dimension_numbers = #tpu.dot_dimension_numbers<[1], [0], [0], [1], [0, 0, 1, 1], [], []>} : vector<2x100xf32>, vector<100x10xf32>, vector<2x10xf32> -> vector<2x10xf32>
    %c100 = arith.constant 100 : index
    %c0_35 = arith.constant 0 : index
    %87 = vector.load %arg3[%c100, %c0_35] : memref<101x10xf32, #tpu.memory_space<vmem>>, vector<1x10xf32>
    %88 = vector.broadcast %87 : vector<1x10xf32> to vector<2x10xf32>
    %89 = arith.addf %86, %88 : vector<2x10xf32>
    %cst_36 = arith.constant dense<0xFF800000> : vector<2xf32>
    %90 = vector.multi_reduction <maximumf>, %89, %cst_36 [1] : vector<2x10xf32> to vector<2xf32>
    %91 = vector.shape_cast %90 : vector<2xf32> to vector<2x1xf32>
    %92 = vector.broadcast %91 : vector<2x1xf32> to vector<2x10xf32>
    %93 = arith.subf %89, %92 : vector<2x10xf32>
    %94 = math.exp %93 : vector<2x10xf32>
    %cst_37 = arith.constant dense<0.000000e+00> : vector<2xf32>
    %95 = vector.multi_reduction <add>, %94, %cst_37 [1] : vector<2x10xf32> to vector<2xf32>
    %96 = vector.shape_cast %95 : vector<2xf32> to vector<2x1xf32>
    %97 = vector.broadcast %96 : vector<2x1xf32> to vector<2x10xf32>
    %98 = arith.divf %94, %97 : vector<2x10xf32>
    %c0_38 = arith.constant 0 : index
    %c0_39 = arith.constant 0 : index
    %99 = vector.load %arg4[%c0_38, %c0_39] : memref<2x10xf32, #tpu.memory_space<vmem>>, vector<2x10xf32>
    tpu.vector_store %arg4[%c0_38, %c0_39], %98 {strides = array<i32>} : memref<2x10xf32, #tpu.memory_space<vmem>>, vector<2x10xf32>,
    return
  }
}

</mosaic_0001>

<bundles_post_ra>
// kernel: net_forward.1
= control target key start
LH: loop header
LB: loop body
LE: loop exit
PB: predicated region body
PF: predicated region fallthrough
CT: control target
= control target key end

     0   :  { %v19_v0 = vlaneseq  ;;  %vm58_vm0 = vcmask 523264   ;;  %s2387_s0 = inlined_call_operand.vmem [shape: s32[1,20], index: 0, kind: input, shape index: {}]   ;;  %s2388_s1 = inlined_call_operand.vmem [shape: f32[234,64], index: 1, kind: input, shape index: {}]   ;;  %s2389_s2 = inlined_call_operand.vmem [shape: f32[193,100], index: 2, kind: input, shape index: {}]   ;;  %s2390_s3 = inlined_call_operand.vmem [shape: f32[101,10], index: 3, kind: input, shape index: {}]   ;;  %s2391_s4 = inlined_call_operand.hbm [shape: f32[2,10], index: 4, kind: output, shape index: {}]  }
   0x1   :  { %v56_v1 = vld [vmem:[%s2388_s1 + $0xe0] sm:$0xff] }
   0x2   :  { %v1424_v2 = vld [vmem:[%s2387_s0] ss:$0 sm:$0xff]  ;;  %1602 = vmatprep.mubr.msk.f32.mxu0 %vm58_vm0, %v56_v1 }
   0x3   :  { %9 = vsyncpa [#allocation3], 0  ;;  %v2036_v3 = vshrl.u32 %v19_v0, 7  ;;  %v1996_v9 = vmov 1.0|1.0   ;;  %v154_v13 = vld [vmem:[%s2388_s1 + $0xa] sm:$0xff] }
   0x4   :  { %v57_v12 = vld [vmem:[%s2388_s1 + $0xe8] sm:$0x3]  ;;  %v155_v14 = vld [vmem:[%s2388_s1 + $0x12] sm:$0x3]  ;;  %vm142_vm13 = vcmask 1041408   ;;  %v1997_v16 = vmov 0.0|0.0  }
   0x5   :  { %v21_v4 = vadd.s32 8, %v2036_v3  ;;  %vm32_vm1 = vcmp.eq.s32.totalorder %v2036_v3, %v1424_v2  ;;  %v22_v5 = vadd.s32 16, %v2036_v3  ;;  %v23_v6 = vadd.s32 24, %v2036_v3  ;;  %1831 = vmatprep.subr.bf16.mxu1 %v1997_v16  ;;  %s2001_s24 = smov 118   ;;  %v152_v24 = vld [vmem:[%s2388_s1] sm:$0xff]  ;;  %v342_v38 = vld [vmem:[%s2388_s1 + $0x14] sm:$0xff] }
   0x6   :  { %v24_v7 = vadd.s32 32, %v2036_v3  ;;  %v25_v8 = vadd.s32 40, %v2036_v3  ;;  %v26_v10 = vadd.s32 48, %v2036_v3  ;;  %v27_v11 = vadd.s32 56, %v2036_v3  ;;  %v153_v25 = vld [vmem:[%s2388_s1 + $0x8] sm:$0x3] }
   0x7   :  { %vm33_vm2 = vcmp.eq.s32.totalorder %v21_v4, %v1424_v2  ;;  %vm34_vm3 = vcmp.eq.s32.totalorder %v22_v5, %v1424_v2  ;;  %vm35_vm4 = vcmp.eq.s32.totalorder %v23_v6, %v1424_v2  ;;  %v1832_v15 = vpack.c.bf16 %v155_v14, %v154_v13  ;;  %v343_v39 = vld [vmem:[%s2388_s1 + $0x1c] sm:$0x3]  ;;  %v461_v43 = vld [vmem:[%s2388_s1 + $0x60] sm:$0xff]  ;;  %v462_v44 = vld [vmem:[%s2388_s1 + $0x68] sm:$0xff] }
   0x8   :  { %vm1815_vm5 = vmpackc.low %vm33_vm2, %vm32_vm1  ;;  %vm36_vm7 = vcmp.eq.s32.totalorder %v24_v7, %v1424_v2  ;;  %vm37_vm8 = vcmp.eq.s32.totalorder %v25_v8, %v1424_v2  ;;  %vm38_vm10 = vcmp.eq.s32.totalorder %v26_v10, %v1424_v2  ;;  %vm39_vm11 = vcmp.eq.s32.totalorder %v27_v11, %v1424_v2  ;;  %v463_v46 = vld [vmem:[%s2388_s1 + $0x70] sm:$0xff]  ;;  %v464_v47 = vld [vmem:[%s2388_s1 + $0x78] sm:$0xff] }
   0x9   :  { %1816 = vmatprep.subr.msk.bf16.mxu0 %vm1815_vm5, %v1996_v9  ;;  %vm1819_vm6 = vmpackc.low %vm35_vm4, %vm34_vm3  ;;  %vm1998_vm14 = vmmov 1   ;;  %vm1999_vm1 = vmmov 0   ;;  %v2000_v18 = vmov 0.0   ;;  %vm157_vm2 = vcmask 1046528   ;;  %v465_v49 = vld [vmem:[%s2388_s1 + $0x80] sm:$0xff]  ;;  %v466_v50 = vld [vmem:[%s2388_s1 + $0x88] sm:$0xff] }
   0xa   :  { %1818 = vmatpush3.bf16.msk.msra.mxu0 %vm1815_vm5, %v1996_v9  ;;  %vm1823_vm9 = vmpackc.low %vm37_vm8, %vm36_vm7  ;;  %1609 = vmatprep.mubr.msk.f32.mxu1 %vm1999_vm1, %v2000_v18  ;;  %vm163_vm3 = vcmask 80896   ;;  %v1836_v28 = vpack.c.bf16 %v153_v25, %v152_v24  ;;  %vm344_vm4 = vcmask 1045504   ;;  %v1840_v40 = vpack.c.bf16 %v343_v39, %v342_v38  ;;  %v467_v52 = vld [vmem:[%s2388_s1 + $0x90] sm:$0xff]  ;;  %v468_v53 = vld [vmem:[%s2388_s1 + $0x98] sm:$0xff] }
   0xb   :  { %1820 = vmatprep.subr.msk.bf16.mxu0 %vm1819_vm6, %v1996_v9  ;;  %vm1827_vm12 = vmpackc.low %vm39_vm11, %vm38_vm10  ;;  %v1843_v45 = vpack.c.bf16 %v462_v44, %v461_v43  ;;  %v1847_v48 = vpack.c.bf16 %v464_v47, %v463_v46  ;;  %v1851_v51 = vpack.c.bf16 %v466_v50, %v465_v49  ;;  %v1855_v54 = vpack.c.bf16 %v468_v53, %v467_v52  ;;  %v453_v55 = vld [vmem:[%s2388_s1 + $0x20] sm:$0xff]  ;;  %v454_v56 = vld [vmem:[%s2388_s1 + $0x28] sm:$0xff] }
   0xc   :  { %vm2058_vm15 = vmpackc.low %vm142_vm13, %vm1998_vm14  ;;  %v1859_v57 = vpack.c.bf16 %v454_v56, %v453_v55  ;;  %v460_v46 = vld [vmem:[%s2388_s1 + $0x58] sm:$0xff]  ;;  %v636_v49 = vld [vmem:[%s2388_s1 + $0xa8] sm:$0xff]  ;;  %vm1319_vm10 = vcmask 818176   ;;  %vm1397_vm11 = vcmask 74752  }
   0xd   :  { %1834 = vmatpush3.bf16.msk.msra.mxu1 %vm2058_vm15, %v1832_v15  ;;  %v638_v52 = vld [vmem:[%s2388_s1 + $0xb8] sm:$0xff]  ;;  %v640_v55 = vld [vmem:[%s2388_s1 + $0xc8] sm:$0xff] }
   0xe   :  { %1822 = vmatpush3.bf16.msk.msra.mxu0 %vm1819_vm6, %v1996_v9  ;;  %1835 = vmatprep.subr.bf16.mxu1 %v1997_v16  ;;  %vm744_vm6 = vcmask 130048  }
   0xf   :  { %1824 = vmatprep.subr.msk.bf16.mxu0 %vm1823_vm9, %v1996_v9 }
  0x12   :  { %1826 = vmatpush3.bf16.msk.msra.mxu0 %vm1823_vm9, %v1996_v9 }
  0x13   :  { %1828 = vmatprep.subr.msk.bf16.mxu0 %vm1827_vm12, %v1996_v9 }
  0x16   :  { %1830 = vmatpush3.bf16.msk.msra.mxu0 %vm1827_vm12, %v1996_v9 }
  0x17   :  { %1891 = vmatprep.subr.bf16.mxu0 %v1997_v16 }
  0x19   :  { %1603 = vmatmul.mubr.msk.f32.vlgmr.msra.gmra.mrb[0].mxu0 %vm58_vm0, %v57_v12  ;;  %v1455_v12 = vld [vmem:[%s2388_s1 + $0x1e] ss:$0 sm:$0xff] }
  0x1a   :  { %1705 = vmatprep.mubr.msk.f32.mxu0 %vm1999_vm1, %v2000_v18 }
  0xec   :  { %v1604_v19 = vpop.f32.mrb[0].mxu0 }
  0xed   :  { %v144_v20 = vrot.slane %v1604_v19, 6  ;;  %v131_v21 = vpop.f32.mrb[1].mxu0 }
  0xee   :  { %v143_v22 = vrot.slane %v131_v21, 6  ;;  %v158_v29 = vrot.slane %v131_v21, 1  ;;  %v345_v30 = vrot.slane %v131_v21, 2 }
  0xf0   :  { %146 = vrot.lane.b32.xlu0 %v143_v22, %s2001_s24  ;;  %v145_v23 = vsel %vm142_vm13, %v143_v22, %v144_v20 }
  0xf4   :  { %148 = vrot.lane.b32.xlu0 %v145_v23, %s2001_s24 }
 0x162   :  { %v147_v26 = vpop.permute.xlu0 %146 }
 0x163   :  { %v151_v27 = vsel %vm142_vm13, %v1604_v19, %v147_v26 }
 0x164   :  { %v159_v31 = vrot.slane %v151_v27, 1  ;;  %v346_v32 = vrot.slane %v151_v27, 2 }
 0x166   :  { %v149_v33 = vpop.permute.xlu0 %148  ;;  %v160_v34 = vsel %vm157_vm2, %v158_v29, %v159_v31  ;;  %v347_v35 = vsel %vm344_vm4, %v345_v30, %v346_v32 }
 0x167   :  { %v161_v36 = vrot.slane %v149_v33, 1  ;;  %1610 = vmatmul.mubr.msk.f32.vlgmr.msra.gmra.mrb[0].mxu1 %vm163_vm3, %v160_v34  ;;  %v348_v41 = vrot.slane %v149_v33, 2  ;;  %v455_v34 = vld [vmem:[%s2388_s1 + $0x30] sm:$0xff] }
 0x168   :  { %1838 = vmatpush3.bf16.msk.msra.mxu1 %vm2058_vm15, %v1836_v28  ;;  %1612 = vmatprep.mubr.msk.f32.mxu1 %vm1999_vm1, %v2000_v18 }
 0x169   :  { %v162_v37 = vsel %vm157_vm2, %v159_v31, %v161_v36  ;;  %1839 = vmatprep.subr.bf16.mxu1 %v1997_v16  ;;  %v349_v42 = vsel %vm344_vm4, %v346_v32, %v348_v41 }
 0x16b   :  { %1613 = vmatmul.mubr.msk.f32.gmra.mrb[2].mxu1 %vm163_vm3, %v162_v37 }
 0x16c   :  { %1615 = vmatprep.mubr.msk.f32.mxu1 %vm1999_vm1, %v2000_v18 }
 0x16f   :  { %1616 = vmatmul.mubr.msk.f32.gmra.mrb[4].mxu1 %vm163_vm3, %v161_v36 }
 0x170   :  { %1622 = vmatprep.mubr.msk.f32.mxu1 %vm1999_vm1, %v2000_v18 }
 0x173   :  { %1623 = vmatmul.mubr.msk.f32.vlgmr.msra.gmra.mrb[6].mxu1 %vm163_vm3, %v131_v21 }
 0x174   :  { %1842 = vmatpush3.bf16.msk.msra.mxu1 %vm2058_vm15, %v1840_v40  ;;  %1625 = vmatprep.mubr.msk.f32.mxu1 %vm1999_vm1, %v2000_v18 }
 0x175   :  { %1844 = vmatprep.subr.bf16.mxu1 %v1843_v45 }
 0x177   :  { %1626 = vmatmul.mubr.msk.f32.gmra.mrb[8].mxu1 %vm163_vm3, %v151_v27 }
 0x178   :  { %1628 = vmatprep.mubr.msk.f32.mxu1 %vm1999_vm1, %v2000_v18 }
 0x17b   :  { %1629 = vmatmul.mubr.msk.f32.gmra.mrb[10].mxu1 %vm163_vm3, %v149_v33 }
 0x17c   :  { %1635 = vmatprep.mubr.msk.f32.mxu1 %vm1999_vm1, %v2000_v18 }
 0x17f   :  { %1636 = vmatmul.mubr.msk.f32.vlgmr.msra.gmra.mrb[12].mxu1 %vm163_vm3, %v347_v35  ;;  %v456_v35 = vld [vmem:[%s2388_s1 + $0x38] sm:$0xff] }
 0x180   :  { %1638 = vmatprep.mubr.msk.f32.mxu1 %vm1999_vm1, %v2000_v18  ;;  %1846 = vmatpush3.bf16.msra.mxu1 %v1843_v45  ;;  %v1863_v39 = vpack.c.bf16 %v456_v35, %v455_v34  ;;  %v459_v45 = vld [vmem:[%s2388_s1 + $0x50] sm:$0xff]  ;;  %v1217_v34 = vld [vmem:[%s2389_s2 + $0xa8] sm:$0xff] }
 0x181   :  { %1848 = vmatprep.subr.bf16.mxu1 %v1847_v48  ;;  %v1871_v47 = vpack.c.bf16 %v460_v46, %v459_v45 }
 0x183   :  { %1639 = vmatmul.mubr.msk.f32.gmra.mrb[14].mxu1 %vm163_vm3, %v349_v42  ;;  %v458_v42 = vld [vmem:[%s2388_s1 + $0x48] sm:$0xff] }
 0x184   :  { %1641 = vmatprep.mubr.msk.f32.mxu1 %vm1999_vm1, %v2000_v18  ;;  %1850 = vmatpush3.bf16.msra.mxu1 %v1847_v48  ;;  %v635_v48 = vld [vmem:[%s2388_s1 + $0xa0] sm:$0xff] }
 0x185   :  { %1852 = vmatprep.subr.bf16.mxu1 %v1851_v51  ;;  %v1875_v50 = vpack.c.bf16 %v636_v49, %v635_v48  ;;  %v1052_v49 = vld [vmem:[%s2389_s2 + $0x10] sm:$0xff] }
 0x187   :  { %1642 = vmatmul.mubr.msk.f32.gmra.mrb[16].mxu1 %vm163_vm3, %v348_v41  ;;  %v457_v41 = vld [vmem:[%s2388_s1 + $0x40] sm:$0xff] }
 0x188   :  { %1854 = vmatpush3.bf16.msra.mxu1 %v1851_v51  ;;  %v1867_v44 = vpack.c.bf16 %v458_v42, %v457_v41  ;;  %v637_v51 = vld [vmem:[%s2388_s1 + $0xb0] sm:$0xff] }
 0x189   :  { %1856 = vmatprep.subr.bf16.mxu1 %v1855_v54  ;;  %v1879_v53 = vpack.c.bf16 %v638_v52, %v637_v51 }
 0x18c   :  { %1858 = vmatpush3.bf16.msra.mxu1 %v1855_v54  ;;  %v639_v54 = vld [vmem:[%s2388_s1 + $0xc0] sm:$0xff] }
 0x18d   :  { %1860 = vmatprep.subr.bf16.mxu1 %v1859_v57  ;;  %v1883_v56 = vpack.c.bf16 %v640_v55, %v639_v54  ;;  %v1055_v54 = vld [vmem:[%s2389_s2 + $0x28] sm:$0xff] }
 0x23a   :  { %v239_v58 = vpop.f32.mrb[0].mxu1 }
 0x23b   :  { %v1611_v59 = vpop.f32.mrb[1].mxu1 }
 0x23e   :  { %v244_v60 = vpop.f32.mrb[2].mxu1 }
 0x23f   :  { %v1614_v61 = vpop.f32.mrb[3].mxu1 }
 0x242   :  { %v249_v62 = vpop.f32.mrb[4].mxu1 }
 0x243   :  { %v1617_v63 = vpop.f32.mrb[5].mxu1 }
 0x246   :  { %v328_v1 = vpop.f32.mrb[6].mxu1 }
 0x247   :  { %v329_v2 = vadd.f32 %v328_v1, %v239_v58  ;;  %v1624_v4 = vpop.f32.mrb[7].mxu1  ;;  %v642_v58 = vld [vmem:[%s2388_s1 + $0xd8] sm:$0xff]  ;;  %v739_v1 = vand.u32 127, %v19_v0 }
 0x24a   :  { %v333_v5 = vpop.f32.mrb[8].mxu1 }
 0x24b   :  { %v334_v6 = vadd.f32 %v333_v5, %v244_v60  ;;  %v1627_v7 = vpop.f32.mrb[9].mxu1  ;;  %v1462_v60 = vld [vmem:[%s2388_s1 + $0x1f] ss:$0 sm:$0xff] }
 0x24e   :  { %v338_v8 = vpop.f32.mrb[10].mxu1 }
 0x24f   :  { %v339_v9 = vadd.f32 %v338_v8, %v249_v62  ;;  %v1630_v10 = vpop.f32.mrb[11].mxu1 }
 0x252   :  { %v425_v11 = vpop.f32.mrb[12].mxu1 }
 0x253   :  { %v439_v13 = vadd.f32 %v425_v11, %v329_v2  ;;  %v1637_v14 = vpop.f32.mrb[13].mxu1  ;;  %v740_v2 = vmul.u32 10, %v2036_v3 }
 0x255   :  { %v447_v15 = vadd.f32 %v1455_v12, %v439_v13  ;;  %vm741_vm5 = vcmp.eq.s32.totalorder %v739_v1, %v740_v2  ;;  %v818_v7 = vadd.s32 2, %v740_v2  ;;  %v895_v10 = vadd.s32 3, %v740_v2  ;;  %v1059_v13 = vld [vmem:[%s2389_s2 + $0x48] sm:$0xff] }
 0x256   :  { %v430_v17 = vpop.f32.mrb[14].mxu1  ;;  %v973_v3 = vadd.s32 5, %v740_v2  ;;  %v1305_v2 = vld [vmem:[%s2390_s3 + $0x20] sm:$0xff] }
 0x257   :  { %v440_v19 = vadd.f32 %v430_v17, %v334_v6  ;;  %v1640_v20 = vpop.f32.mrb[15].mxu1  ;;  %v450_v21 = vmax.f32 %v447_v15, 0.0  ;;  %vm819_vm7 = vcmp.eq.s32.totalorder %v739_v1, %v818_v7  ;;  %vm896_vm8 = vcmp.eq.s32.totalorder %v739_v1, %v895_v10  ;;  %v1060_v17 = vld [vmem:[%s2389_s2 + $0x50] sm:$0xff]  ;;  %v1309_v10 = vld [vmem:[%s2390_s3 + $0x40] sm:$0xff] }
 0x258   :  { %v1465_v0 = vsel %vm819_vm7, 1.0, %v2000_v18  ;;  %v1467_v11 = vsel %vm896_vm8, 1.0, %v2000_v18  ;;  %vm974_vm9 = vcmp.eq.s32.totalorder %v739_v1, %v973_v3  ;;  %v1304_v1 = vld [vmem:[%s2390_s3 + $0x18] sm:$0xff]  ;;  %v1307_v7 = vld [vmem:[%s2390_s3 + $0x30] sm:$0xff] }
 0x259   :  { %v448_v22 = vadd.f32 %v1455_v12, %v440_v19  ;;  %v472_v27 = vrot.slane %v450_v21, 1  ;;  %v643_v28 = vrot.slane %v450_v21, 2  ;;  %v1469_v14 = vsel %vm974_vm9, 1.0, %v2000_v18  ;;  %v1061_v19 = vld [vmem:[%s2389_s2 + $0x58] sm:$0xff] }
 0x25a   :  { %v435_v23 = vpop.f32.mrb[16].mxu1  ;;  %v1907_v20 = vpack.c.bf16 %v1061_v19, %v1060_v17 }
 0x25b   :  { %v451_v24 = vmax.f32 %v448_v22, 0.0  ;;  %v441_v25 = vadd.f32 %v435_v23, %v339_v9  ;;  %v1643_v26 = vpop.f32.mrb[17].mxu1  ;;  %v1463_v9 = vsel %vm741_vm5, 1.0, %v2000_v18  ;;  %v1063_v22 = vld [vmem:[%s2389_s2 + $0x68] sm:$0xff] }
 0x25d   :  { %v473_v29 = vrot.slane %v451_v24, 1  ;;  %v644_v30 = vrot.slane %v451_v24, 2  ;;  %v449_v31 = vadd.f32 %v1455_v12, %v441_v25  ;;  %v1058_v12 = vld [vmem:[%s2389_s2 + $0x40] sm:$0xff]  ;;  %v1065_v25 = vld [vmem:[%s2389_s2 + $0x78] sm:$0xff] }
 0x25e   :  { %v1904_v15 = vpack.c.bf16 %v1059_v13, %v1058_v12  ;;  %v1312_v12 = vld [vmem:[%s2390_s3 + $0x58] sm:$0xff] }
 0x25f   :  { %v452_v32 = vmax.f32 %v449_v31, 0.0  ;;  %v474_v33 = vsel %vm157_vm2, %v472_v27, %v473_v29  ;;  %v645_v36 = vsel %vm344_vm4, %v643_v28, %v644_v30  ;;  %v1212_v27 = vld [vmem:[%s2389_s2 + $0x80] sm:$0xff]  ;;  %v1213_v28 = vld [vmem:[%s2389_s2 + $0x88] sm:$0xff]  ;;  %v1215_v31 = vld [vmem:[%s2389_s2 + $0x98] sm:$0xff] }
 0x260   :  { %1660 = vmatprep.mubr.msk.f32.mxu1 %vm58_vm0, %v474_v33  ;;  %v1216_v33 = vld [vmem:[%s2389_s2 + $0xa0] sm:$0xff] }
 0x261   :  { %v475_v37 = vrot.slane %v452_v32, 1  ;;  %v646_v38 = vrot.slane %v452_v32, 2  ;;  %v1934_v35 = vpack.c.bf16 %v1217_v34, %v1216_v33 }
 0x263   :  { %v476_v40 = vsel %vm157_vm2, %v473_v29, %v475_v37  ;;  %v647_v43 = vsel %vm344_vm4, %v644_v30, %v646_v38  ;;  %v1928_v29 = vpack.c.bf16 %v1213_v28, %v1212_v27  ;;  %v1214_v30 = vld [vmem:[%s2389_s2 + $0x90] sm:$0xff]  ;;  %v1219_v37 = vld [vmem:[%s2389_s2 + $0xb8] sm:$0xff] }
 0x264   :  { %1661 = vmatmul.mubr.msk.f32.vlgmr.msra.gmra.mrb[18].mxu1 %vm58_vm0, %v476_v40  ;;  %v1931_v32 = vpack.c.bf16 %v1215_v31, %v1214_v30 }
 0x265   :  { %1862 = vmatpush3.bf16.msra.mxu1 %v1859_v57  ;;  %1679 = vmatprep.mubr.msk.f32.mxu1 %vm58_vm0, %v450_v21  ;;  %v641_v57 = vld [vmem:[%s2388_s1 + $0xd0] sm:$0xff]  ;;  %v1062_v21 = vld [vmem:[%s2389_s2 + $0x60] sm:$0xff] }
 0x266   :  { %1864 = vmatprep.subr.bf16.mxu1 %v1863_v39  ;;  %v1887_v59 = vpack.c.bf16 %v642_v58, %v641_v57  ;;  %v1910_v23 = vpack.c.bf16 %v1063_v22, %v1062_v21  ;;  %v1056_v57 = vld [vmem:[%s2389_s2 + $0x30] sm:$0xff]  ;;  %v1057_v58 = vld [vmem:[%s2389_s2 + $0x38] sm:$0xff] }
 0x269   :  { %1866 = vmatpush3.bf16.msra.mxu1 %v1863_v39 }
 0x26a   :  { %1868 = vmatprep.subr.bf16.mxu1 %v1867_v44 }
 0x26d   :  { %1870 = vmatpush3.bf16.msra.mxu1 %v1867_v44  ;;  %v1051_v44 = vld [vmem:[%s2389_s2 + $0x8] sm:$0xff] }
 0x26e   :  { %1872 = vmatprep.subr.bf16.mxu1 %v1871_v47 }
 0x271   :  { %1874 = vmatpush3.bf16.msra.mxu1 %v1871_v47 }
 0x272   :  { %1876 = vmatprep.subr.bf16.mxu1 %v1875_v50 }
 0x274   :  { %1680 = vmatmul.mubr.msk.f32.vlgmr.msra.gmra.mrb[18].mxu1 %vm58_vm0, %v451_v24  ;;  %v1064_v24 = vld [vmem:[%s2389_s2 + $0x70] sm:$0xff] }
 0x275   :  { %1878 = vmatpush3.bf16.msra.mxu1 %v1875_v50  ;;  %1698 = vmatprep.mubr.msk.f32.mxu1 %vm58_vm0, %v645_v36  ;;  %v1913_v26 = vpack.c.bf16 %v1065_v25, %v1064_v24  ;;  %v1218_v36 = vld [vmem:[%s2389_s2 + $0xb0] sm:$0xff]  ;;  %v1053_v50 = vld [vmem:[%s2389_s2 + $0x18] sm:$0xff] }
 0x276   :  { %1880 = vmatprep.subr.bf16.mxu1 %v1879_v53  ;;  %v1937_v38 = vpack.c.bf16 %v1219_v37, %v1218_v36  ;;  %v1919_v51 = vpack.c.bf16 %v1053_v50, %v1052_v49 }
 0x279   :  { %1882 = vmatpush3.bf16.msra.mxu1 %v1879_v53  ;;  %v1054_v53 = vld [vmem:[%s2389_s2 + $0x20] sm:$0xff] }
 0x27a   :  { %1884 = vmatprep.subr.bf16.mxu1 %v1883_v56 }
 0x27d   :  { %1886 = vmatpush3.bf16.msra.mxu1 %v1883_v56  ;;  %v1922_v56 = vpack.c.bf16 %v1055_v54, %v1054_v53 }
 0x27e   :  { %1888 = vmatprep.subr.bf16.mxu1 %v1887_v59 }
 0x281   :  { %1890 = vmatpush3.bf16.msra.mxu1 %v1887_v59  ;;  %v1925_v59 = vpack.c.bf16 %v1057_v58, %v1056_v57 }
 0x282   :  { %1927 = vmatprep.subr.bf16.mxu1 %v1997_v16 }
 0x284   :  { %1699 = vmatmul.mubr.msk.f32.vlgmr.msra.gmra.mrb[18].mxu1 %vm58_vm0, %v647_v43  ;;  %v1050_v43 = vld [vmem:[%s2389_s2] sm:$0xff] }
 0x285   :  { %1783 = vmatprep.mubr.msk.f32.mxu1 %vm1999_vm1, %v2000_v18  ;;  %1929 = vmatpush3.bf16.msra.mxu1 %v1928_v29  ;;  %v1916_v46 = vpack.c.bf16 %v1051_v44, %v1050_v43 }
 0x286   :  { %1930 = vmatprep.subr.bf16.mxu1 %v1997_v16 }
 0x289   :  { %1932 = vmatpush3.bf16.msra.mxu1 %v1931_v32 }
 0x28a   :  { %1933 = vmatprep.subr.bf16.mxu1 %v1997_v16 }
 0x28d   :  { %1935 = vmatpush3.bf16.msra.mxu1 %v1934_v35 }
 0x28e   :  { %1936 = vmatprep.subr.bf16.mxu1 %v1997_v16 }
 0x291   :  { %1938 = vmatpush3.bf16.msra.mxu1 %v1937_v38 }
 0x357   :  { %v1700_v61 = vpop.f32.mrb[18].mxu1 }
 0x358   :  { %v735_v62 = vadd.f32 %v1700_v61, %v1462_v60  ;;  %v718_v63 = vpop.f32.mrb[19].mxu1  ;;  %v1302_v61 = vld [vmem:[%s2390_s3 + $0x8] sm:$0xff] }
 0x359   :  { %v734_v4 = vadd.f32 %v1462_v60, %v718_v63  ;;  %v1301_v60 = vld [vmem:[%s2390_s3] sm:$0xff]  ;;  %v1303_v63 = vld [vmem:[%s2390_s3 + $0x10] sm:$0xff] }
 0x35a   :  { %v737_v5 = vmax.f32 %v735_v62, 0.0  ;;  %v1940_v62 = vpack.c.bf16 %v1302_v61, %v1301_v60 }
 0x35b   :  { %v736_v6 = vmax.f32 %v734_v4, 0.0  ;;  %v1943_v4 = vpack.c.bf16 %v1304_v1, %v1303_v63 }
 0x35d   :  { %v1892_v8 = vpack.c.bf16 %v737_v5, %v736_v6  ;;  %v1306_v5 = vld [vmem:[%s2390_s3 + $0x28] sm:$0xff] }
 0x35e   :  { %v1946_v6 = vpack.c.bf16 %v1306_v5, %v1305_v2 }
 0x35f   :  { %1893 = vmatpush3.bf16.msra.mxu0 %v1892_v8 }
 0x360   :  { %1894 = vmatprep.subr.bf16.mxu0 %v1997_v16 }
 0x362   :  { %1706 = vmatmul.mubr.msk.f32.vlgmr.msra.gmra.mrb[2].mxu0 %vm744_vm6, %v1463_v9 }
 0x363   :  { %1896 = vmatpush3.bf16.msra.mxu0 %v1892_v8  ;;  %1712 = vmatprep.mubr.msk.f32.mxu0 %vm1999_vm1, %v2000_v18 }
 0x364   :  { %1897 = vmatprep.subr.bf16.mxu0 %v1997_v16 }
 0x366   :  { %1713 = vmatmul.mubr.msk.f32.vlgmr.msra.gmra.mrb[4].mxu0 %vm744_vm6, %v1465_v0  ;;  %v1310_v0 = vld [vmem:[%s2390_s3 + $0x48] sm:$0xff] }
 0x367   :  { %1899 = vmatpush3.bf16.msra.mxu0 %v1892_v8  ;;  %1719 = vmatprep.mubr.msk.f32.mxu0 %vm1999_vm1, %v2000_v18  ;;  %v1952_v3 = vpack.c.bf16 %v1310_v0, %v1309_v10 }
 0x368   :  { %1900 = vmatprep.subr.bf16.mxu0 %v1997_v16 }
 0x36a   :  { %1720 = vmatmul.mubr.msk.f32.vlgmr.msra.gmra.mrb[6].mxu0 %vm744_vm6, %v1467_v11  ;;  %v1311_v11 = vld [vmem:[%s2390_s3 + $0x50] sm:$0xff] }
 0x36b   :  { %1902 = vmatpush3.bf16.msra.mxu0 %v1892_v8  ;;  %1726 = vmatprep.mubr.msk.f32.mxu0 %vm1999_vm1, %v2000_v18  ;;  %v1308_v8 = vld [vmem:[%s2390_s3 + $0x38] sm:$0xff]  ;;  %v1955_v13 = vpack.c.bf16 %v1312_v12, %v1311_v11 }
 0x36c   :  { %1903 = vmatprep.subr.bf16.mxu0 %v1997_v16  ;;  %v1949_v9 = vpack.c.bf16 %v1308_v8, %v1307_v7 }
 0x36e   :  { %1727 = vmatmul.mubr.msk.f32.vlgmr.msra.gmra.mrb[8].mxu0 %vm744_vm6, %v1469_v14  ;;  %v1313_v14 = vld [vmem:[%s2390_s3 + $0x60] sm:$0xf] }
 0x36f   :  { %1905 = vmatpush3.bf16.msra.mxu0 %v1904_v15  ;;  %1745 = vmatprep.mubr.msk.f32.mxu0 %vm1999_vm1, %v2000_v18 }
 0x370   :  { %1906 = vmatprep.subr.bf16.mxu0 %v1997_v16 }
 0x373   :  { %1908 = vmatpush3.bf16.msra.mxu0 %v1907_v20 }
 0x374   :  { %1909 = vmatprep.subr.bf16.mxu0 %v1997_v16 }
 0x377   :  { %1911 = vmatpush3.bf16.msra.mxu0 %v1910_v23  ;;  %v1474_v23 = vld [vmem:[%s2389_s2 + $0xc0] ss:$0 sm:$0xff]  ;;  %s2002_s2 = smov [#allocation2]  }
 0x378   :  { %1912 = vmatprep.subr.bf16.mxu0 %v1997_v16  ;;  %s1416_s25 = sshll.u32 %s2002_s2, 4  ;;  %s1417_s25 = int_to_ptr.vmem [resolvable:$true] %s1416_s25 }
 0x379   :  { %p1977_p1 = scmp.lt.s32.totalorder %s1417_s25, %s1417_s25 }
 0x37b   :  { %1914 = vmatpush3.bf16.msra.mxu0 %v1913_v26  ;;  %v1475_v26 = vld [vmem:[%s2390_s3 + $0x64] ss:$0 sm:$0xff]  ;;  %s1972_s3 = scalar_lea.vmem %s1417_s25, 32 }
 0x37c   :  { %1915 = vmatprep.subr.bf16.mxu0 %v1997_v16  ;;  %p1973_p0 = scmp.ne.s32.totalorder %s1417_s25, %s1972_s3  ;;  %p1978_p2 = scmp.lt.s32.totalorder %s1972_s3, %s1972_s3 }
 0x37e   :  { %p1979_p3 = por %p1978_p2, %p1977_p1 }
 0x380   :  { %p1980_p4 = pnand %p1979_p3, %p1973_p0 }
 0x435   :  { %v814_v39 = vpop.f32.mrb[2].mxu0 }
 0x436   :  { %v1707_v40 = vpop.f32.mrb[3].mxu0 }
 0x439   :  { %v891_v41 = vpop.f32.mrb[4].mxu0 }
 0x43a   :  { %v1714_v42 = vpop.f32.mrb[5].mxu0 }
 0x43d   :  { %v968_v45 = vpop.f32.mrb[6].mxu0 }
 0x43e   :  { %v972_v47 = vmax.f32 %v891_v41, %v968_v45  ;;  %v1721_v48 = vpop.f32.mrb[7].mxu0 }
 0x440   :  { %1746 = vmatmul.mubr.msk.f32.vlgmr.msra.gmra.mrb[10].mxu0 %vm58_vm0, %v972_v47 }
 0x441   :  { %1917 = vmatpush3.bf16.msra.mxu0 %v1916_v46  ;;  %1764 = vmatprep.mubr.msk.f32.mxu0 %vm1999_vm1, %v2000_v18  ;;  %v1046_v52 = vpop.f32.mrb[8].mxu0 }
 0x442   :  { %1918 = vmatprep.subr.bf16.mxu0 %v1997_v16  ;;  %v1728_v55 = vpop.f32.mrb[9].mxu0  ;;  %1784 = vmatmul.mubr.msk.f32.vlgmr.msra.gmra.mrb[20].mxu1 %vm58_vm0, %v1046_v52 }
 0x445   :  { %1920 = vmatpush3.bf16.msra.mxu0 %v1919_v51 }
 0x446   :  { %1921 = vmatprep.subr.bf16.mxu0 %v1997_v16 }
 0x449   :  { %1923 = vmatpush3.bf16.msra.mxu0 %v1922_v56 }
 0x44a   :  { %1924 = vmatprep.subr.bf16.mxu0 %v1997_v16 }
 0x44d   :  { %1926 = vmatpush3.bf16.msra.mxu0 %v1925_v59 }
 0x44e   :  { %1939 = vmatprep.subr.bf16.mxu0 %v1997_v16 }
 0x450   :  { %1765 = vmatmul.mubr.msk.f32.vlgmr.msra.gmra.mrb[12].mxu0 %vm58_vm0, %v814_v39  ;;  %vm1323_vm0 = vcmask 1043456  }
 0x451   :  { %1941 = vmatpush3.bf16.msra.mxu0 %v1940_v62  ;;  %1812 = vmatprep.mubr.msk.f32.mxu0 %vm1999_vm1, %v2000_v18 }
 0x452   :  { %1942 = vmatprep.subr.bf16.mxu0 %v1997_v16 }
 0x455   :  { %1944 = vmatpush3.bf16.msra.mxu0 %v1943_v4 }
 0x456   :  { %1945 = vmatprep.subr.bf16.mxu0 %v1997_v16 }
 0x459   :  { %1947 = vmatpush3.bf16.msra.mxu0 %v1946_v6 }
 0x45a   :  { %1948 = vmatprep.subr.bf16.mxu0 %v1997_v16 }
 0x45d   :  { %1950 = vmatpush3.bf16.msra.mxu0 %v1949_v9 }
 0x45e   :  { %1951 = vmatprep.subr.bf16.mxu0 %v1997_v16 }
 0x461   :  { %1953 = vmatpush3.bf16.msra.mxu0 %v1952_v3 }
 0x462   :  { %1954 = vmatprep.subr.bf16.mxu0 %v1997_v16 }
 0x465   :  { %1956 = vmatpush3.bf16.msra.mxu0 %v1955_v13 }
 0x466   :  { %1810 = vmatprep.subr.mxu0 %v2000_v18 }
 0x469   :  { %1811 = vmatpush3.msk.msra.mxu0 %vm1323_vm0, %v1313_v14 }
 0x513   :  { %v1135_v15 = vpop.f32.mrb[10].mxu0 }
 0x514   :  { %v1747_v16 = vpop.f32.mrb[11].mxu0 }
 0x515   :  { %v1289_v17 = vpop.f32.mrb[20].mxu1 }
 0x516   :  { %v1785_v19 = vpop.f32.mrb[21].mxu1 }
 0x523   :  { %v1208_v20 = vpop.f32.mrb[12].mxu0 }
 0x524   :  { %v1209_v21 = vadd.f32 %v1208_v20, %v1135_v15  ;;  %v1766_v22 = vpop.f32.mrb[13].mxu0 }
 0x526   :  { %v1293_v24 = vadd.f32 %v1289_v17, %v1209_v21 }
 0x528   :  { %v1299_v25 = vadd.f32 %v1474_v23, %v1293_v24 }
 0x52a   :  { %v1300_v18 = vmax.f32 %v1299_v25, 0.0 }
 0x52c   :  { %1813 = vmatmul.mubr.msk.f32.vlgmr.msra.gmra.mrb[14].mxu0 %vm1319_vm10, %v1300_v18 }
 0x5ff   :  { %v1393_v27 = vpop.f32.mrb[14].mxu0 }
 0x600   :  { %v1394_v28 = vadd.f32 %v1475_v26, %v1393_v27  ;;  %v1814_v29 = vpop.f32.mrb[15].mxu0 }
 0x602   :  { %v1398_v30 = vsel %vm1397_vm11, %v1394_v28, -inf }
 0x603   :  { %1399 = vmax.xlane.f32.xlu1 %v1398_v30 }
 0x690   :  { %v1400_v31 = vpop.xlane.xlu1 %1399 }
 0x691   :  { %v1401_v32 = vsub.f32 %v1394_v28, %v1400_v31 }
 0x693   :  { %v1402_v33 = vmul.f32 1.442695, %v1401_v32 }
 0x695   :  { %1968 = vpow2.f32 %v1402_v33 }
 0x69f   :  { %v1969_v34 = vpop.eup %1968 }
 0x6a0   :  { %v1404_v35 = vsel %vm1397_vm11, %v1969_v34, 0.0 }
 0x6a1   :  { %1405 = vadd.xlane.f32.xlu1 %v1404_v35 }
 0x72e   :  { %v1406_v36 = vpop.xlane.xlu1 %1405 }
 0x72f   :  { %1970 = vrcp.f32 %v1406_v36 }
 0x739   :  { %v1971_v37 = vpop.eup %1970 }
 0x73a   :  { %v1408_v38 = vmul.f32 %v1971_v37, %v1969_v34 }
 0x73c   :  { %1409 = vst.msk [vmem:[#allocation2] sm:$0x3] %vm1397_vm11, %v1408_v38 }
 0x73d   :  { %1983 = shalt.err (!%p1980_p4)
}
 0x73e   :  { %s1984_s28 = scalar_lea.hbm %s2391_s4, 32 }
 0x73f   :  { %p1985_p5 = scmp.ne.s32.totalorder %s2391_s4, %s1984_s28  ;;  %p1988_p6 = scmp.lt.u32.totalorder %s1984_s28, %s2391_s4 }
 0x741   :  { %p1990_p7 = pnand %p1988_p6, %p1985_p5 }
 0x743   :  { %1993 = shalt.err (!%p1990_p7)
}
 0x744   :  { %1419 = dma.vmem_to_hbm [thread:$0]  %s1417_s25, 32, %s2391_s4, [#allocation3]  }
 0x745   :  { %1994 = dma.done.wait [#allocation3], 32  }
 0x746   :  { %1995 = vsyncadd [#allocation3], 4294967264 }
 0x747   :  { %1423 = vsyncpa [#allocation3], 1 }

</bundles_post_ra>
